<compile_context>
chip_gen: v7x
topology: tpu7x:2x2x1
jax: 0.10.0
libtpu: 0.0.40
codegen_flags: <defaults>
</compile_context>

<pallas_src>
import functools
import math

import jax
import jax.numpy as jnp
from jax.experimental import pallas as pl
from jax.experimental.pallas import tpu as pltpu

TWO_PI = 2.0 * math.pi


def gfp_kernel(x_ref, w_ref, out_ref, *, tile_b):
    """x_ref: (B, 1) resident; w_ref: (1, half) resident; out_ref: (tile_b, 2*half)."""
    half = w_ref.shape[-1]                                   # static
    i = pl.program_id(0)
    start = pl.multiple_of(i * tile_b, 8)                    # sublane-aligned slice start
    xt = x_ref[pl.ds(start, tile_b), :]                      # (tile_b, 1) from resident x
    # Scale the tiny (tile_b, 1) column first, then one broadcast mul against W:
    # one (tile_b,1) VPU mul + one full-tile mul instead of two full-tile muls.
    proj = (xt * TWO_PI) * w_ref[...]                        # (tile_b, half)
    # Store the two halves directly into lane-aligned static slices of the output
    # tile: no concatenate, no relayout; sin/cos run on the EUP.
    out_ref[:, :half] = jnp.sin(proj)
    out_ref[:, half:] = jnp.cos(proj)


def _round_up(x, m):
    return ((x + m - 1) // m) * m


def _pick_batch_tile(b, embed, vmem_budget_bytes):
    """VMEM-aware batch tile: multiple of 8 dividing b, as large as the budget allows."""
    if b % 8 != 0:
        return b                                             # full-array block is always legal
    # f32 bytes live in VMEM per tile row:
    #   double-buffered output tile: 2 * embed * 4
    #   in-body proj / sin / cos temps: budgeted generously as another 2 * embed * 4
    bytes_per_row = 4 * embed * 4
    max_rows = max(8, (vmem_budget_bytes // bytes_per_row) // 8 * 8)
    t = min(b, 1024, max_rows)
    if b >= 1024:
        # Keep >= 2 grid steps (each >= 512 rows) so the "parallel" batch axis shards
        # across both TensorCores on v7x.  No-op on single-TC v5e/v6e.
        t = min(t, max(512, _round_up(-(-b // 2), 8)))
    t = max(8, (t // 8) * 8)
    while b % t:                                             # largest divisor of b, multiple of 8
        t -= 8
    return t


def gaussian_fourier_projection(x, w, *, tile_b=None, vmem_budget_bytes=24 << 20):
    """x: (B,) times, w: (embed_dim//2,) fixed Gaussian weights -> (B, embed_dim) f32."""
    b = x.shape[0]
    half = w.shape[-1] if w.ndim > 1 else w.shape[0]
    embed = 2 * half
    # NOTE: half % 128 == 0 keeps both half-stores unmasked lane-dense vst (biggest
    # measured store-path lever); other sizes are still correct, just slower.

    x2d = x.reshape(b, 1).astype(jnp.float32)                # batch on sublanes
    w2d = w.reshape(1, half).astype(jnp.float32)             # features on lanes

    if tile_b is None:
        tile_b = _pick_batch_tile(b, embed, vmem_budget_bytes)
    assert tile_b % 8 == 0 or tile_b == b, "tile_b must be a multiple of 8 (or == B)"
    assert b % tile_b == 0, "tile_b must divide B"

    kernel = functools.partial(gfp_kernel, tile_b=tile_b)

    return pl.pallas_call(
        kernel,
        out_shape=jax.ShapeDtypeStruct((b, embed), jnp.float32),
        grid_spec=pltpu.PrefetchScalarGridSpec(
            num_scalar_prefetch=0,
            grid=(b // tile_b,),
            in_specs=[
                pl.BlockSpec((b, 1), lambda i: (0, 0)),      # x: whole, VMEM-resident, one DMA
                pl.BlockSpec((1, half), lambda i: (0, 0)),   # W: whole, VMEM-resident, one DMA
            ],
            out_specs=pl.BlockSpec((tile_b, embed), lambda i: (i, 0)),
        ),
        compiler_params=pltpu.CompilerParams(
            dimension_semantics=("parallel",),               # shards batch across TCs on v7x
            vmem_limit_bytes=32 << 20,                       # safe on v5e/v6e/v7x
        ),
    )(x2d, w2d)


def reference(x, w):
    """Pure-JAX transcription of the PyTorch forward."""
    proj = x[:, None] * w[None, :] * TWO_PI
    return jnp.concatenate([jnp.sin(proj), jnp.cos(proj)], axis=-1)


if __name__ == "__main__":
    key = jax.random.PRNGKey(0)
    kw, kx = jax.random.split(key)

    B = 16
    EMBED_DIM = 256            # embed_dim//2 == 128 -> lane-aligned sin/cos halves
    SCALE = 30.0               # module default

    w = jax.random.normal(kw, (EMBED_DIM // 2,), jnp.float32) * SCALE   # non-trainable W
    x = jax.random.uniform(kx, (B,), jnp.float32, minval=0.0, maxval=1.0)

    ref = reference(x, w)

    # Multi-tile path: tile_b=8 -> grid=(2,), exercises pipelining + parallel grid.
    out_tiled = jax.block_until_ready(gaussian_fourier_projection(x, w, tile_b=8))
    assert out_tiled.shape == (B, EMBED_DIM) and out_tiled.dtype == jnp.float32
    assert jnp.allclose(out_tiled, ref, rtol=5e-3, atol=5e-3), "tiled kernel/reference mismatch"

    # Auto-tile (VMEM-aware heuristic) path.
    out_auto = jax.block_until_ready(gaussian_fourier_projection(x, w))
    assert out_auto.shape == (B, EMBED_DIM) and out_auto.dtype == jnp.float32
    assert jnp.allclose(out_auto, ref, rtol=5e-3, atol=5e-3), "auto kernel/reference mismatch"

    print("KERNEL_OK")
</pallas_src>

<mosaic_0001>
module attributes {stable_mosaic.version = 11 : i64} {
  func.func @gfp_kernel(%arg0: i32, %arg1: memref<16x1xf32, #tpu.memory_space<vmem>>, %arg2: memref<1x128xf32, #tpu.memory_space<vmem>>, %arg3: memref<8x256xf32, #tpu.memory_space<vmem>>) attributes {dimension_semantics = [#tpu.dimension_semantics<parallel>], iteration_bounds = array<i64: 2>, scalar_prefetch = 0 : i64, scratch_operands = 0 : i64, tpu.core_type = #tpu.core_type<tc>, window_params = [{pipeline_mode = #tpu.pipeline_mode<synchronous>, transform_indices = @transform_0, window_bounds = array<i64: 16, 1>}, {pipeline_mode = #tpu.pipeline_mode<synchronous>, transform_indices = @transform_1, window_bounds = array<i64: 1, 128>}, {transform_indices = @transform_2, window_bounds = array<i64: 8, 256>}]} {
    %c8_i32 = arith.constant 8 : i32
    %0 = arith.muli %arg0, %c8_i32 : i32
    %1 = tpu.assume_multiple %0, 8 : i32
    %2 = arith.index_cast %1 : i32 to index
    %c0 = arith.constant 0 : index
    %3 = vector.load %arg1[%2, %c0] : memref<16x1xf32, #tpu.memory_space<vmem>>, vector<8x1xf32>
    %cst = arith.constant 6.28318548 : f32
    %4 = vector.broadcast %cst : f32 to vector<8x1xf32>
    %5 = arith.mulf %3, %4 : vector<8x1xf32>
    %c0_0 = arith.constant 0 : index
    %c0_1 = arith.constant 0 : index
    %6 = vector.load %arg2[%c0_0, %c0_1] : memref<1x128xf32, #tpu.memory_space<vmem>>, vector<1x128xf32>
    %7 = vector.broadcast %5 : vector<8x1xf32> to vector<8x128xf32>
    %8 = vector.broadcast %6 : vector<1x128xf32> to vector<8x128xf32>
    %9 = arith.mulf %7, %8 : vector<8x128xf32>
    %10 = math.sin %9 : vector<8x128xf32>
    %c0_2 = arith.constant 0 : index
    %c0_3 = arith.constant 0 : index
    %11 = vector.load %arg3[%c0_2, %c0_3] : memref<8x256xf32, #tpu.memory_space<vmem>>, vector<8x128xf32>
    tpu.vector_store %arg3[%c0_2, %c0_3], %10 {strides = array<i32>} : memref<8x256xf32, #tpu.memory_space<vmem>>, vector<8x128xf32>,
    %12 = math.cos %9 : vector<8x128xf32>
    %c0_4 = arith.constant 0 : index
    %c128 = arith.constant 128 : index
    %13 = vector.load %arg3[%c0_4, %c128] : memref<8x256xf32, #tpu.memory_space<vmem>>, vector<8x128xf32>
    tpu.vector_store %arg3[%c0_4, %c128], %12 {strides = array<i32>} : memref<8x256xf32, #tpu.memory_space<vmem>>, vector<8x128xf32>,
    return
  }
  func.func @transform_0(%arg0: i32) -> (i32, i32) {
    %c0_i32 = arith.constant 0 : i32
    %c0_i32_0 = arith.constant 0 : i32
    %c0_i32_1 = arith.constant 0 : i32
    return %c0_i32, %c0_i32_0 : i32, i32
  }
  func.func @transform_1(%arg0: i32) -> (i32, i32) {
    %c0_i32 = arith.constant 0 : i32
    %c0_i32_0 = arith.constant 0 : i32
    %c0_i32_1 = arith.constant 0 : i32
    return %c0_i32, %c0_i32_0 : i32, i32
  }
  func.func @transform_2(%arg0: i32) -> (i32, i32) {
    %c0_i32 = arith.constant 0 : i32
    %c0_i32_0 = arith.constant 0 : i32
    return %arg0, %c0_i32 : i32, i32
  }
}

</mosaic_0001>

<bundles_post_ra>
// kernel: tpu_custom_call.1
= control target key start
LH: loop header
LB: loop body
LE: loop exit
PB: predicated region body
PF: predicated region fallthrough
CT: control target
= control target key end

     0   :  { %7 = vsyncpa [#allocation3], 0  ;;  %s701_s0 = inlined_call_operand.vmem [shape: f32[16,1], index: 0, kind: input, shape index: {}]   ;;  %s702_s1 = inlined_call_operand.vmem [shape: f32[1,128], index: 1, kind: input, shape index: {}]   ;;  %s703_s2 = inlined_call_operand.hbm [shape: f32[16,256], index: 2, kind: output, shape index: {}]  }
   0x1   :  { %9 = vsyncpa [#allocation3 + $0x1], 0  ;;  %s574_s9 = smov 0   ;;  %s576_s10 = smov 0  }
   0x2   :  { %s578_s11 = smov 0   ;;  %s580_s12 = smov 0  }
   0x3 LB: > { %s595_s13 = sadd.s32 4294967295, %s549_s12   ;;  %s412_s14 = sadd.s32 4294967294, %s549_s12   ;;  %s549_s12 = sphi %s580_s12, %s709_s12   ;;  %s545_s11 = sphi %s578_s11, %s708_s11   ;;  %s541_s10 = sphi %s576_s10, %s707_s10   ;;  %s537_s9 = sphi %s574_s9, %s706_s9  }
   0x4   : > { %s599_s15 = sadd.s32 1, %s549_s12   ;;  %s64_s16 = sadd.s32 1, %s545_s11 }
   0x5   : > { %s61_s17 = ssub.s32 %s549_s12, %s599_s15  ;;  %p74_p0 = scmp.ne.s32.totalorder %s545_s11, %s541_s10 }
   0x6   : > { %p62_p1 = scmp.eq.s32.totalorder %s61_s17, 0  ;;  %p75_p2 = scmp.eq.s32.totalorder %s595_s13, 1 }
   0x7   : > { %p80_p3 = scmp.ne.s32.totalorder %s541_s10, %s537_s9  ;;  %p81_p4 = scmp.eq.s32.totalorder %s412_s14, 1 }
   0x8   : > { %s610_s18 = scalar_select %p62_p1, %s545_s11, %s64_s16  }
   0x9   : > { %p612_p5 = por %p75_p2, %p74_p0  ;;  %p616_p6 = por %p81_p4, %p80_p3 }
   0xa   : > { %p414_p7 = scmp.ge.s32.totalorder %s549_s12, 1  ;;  %p105_p8 = scmp.lt.s32.totalorder %s549_s12, 3 }
   0xc   : > { %p106_p9 = pnand %p414_p7, %p105_p8 }
   0xd   : > { %s416_s21 = sshll.u32 (!%p106_p9), %s595_s13, 3  ;;  %v551_v0 = vmov (!%p106_p9), 0   ;;  %v417_v3 = vld [vmem:[%s702_s1] ss:$0 sm:$0xff] (!%p106_p9)  ;;  %v552_v16 = vmov (!%p106_p9), 683565275  }
   0xe   : > { %109 = sbr.rel (%p106_p9) target bundleno = 241 (0xf1), region = 28  ;;  %482 = vset.pattern.permute.xlu0 (!%p106_p9), %v551_v0  ;;  %s123_s24 = scalar_lea.vmem (!%p106_p9), %s701_s0, %s416_s21  ;;  %v553_v18 = vmov (!%p106_p9), 2475754826   ;;  %v554_v21 = vmov (!%p106_p9), 2131351028  }
   0xf   : > { %v124_v1 = vld [vmem:[%s123_s24] sm:$0xff] (!%p106_p9)  ;;  %v555_v24 = vmov (!%p106_p9), 2102212464   ;;  %v556_v27 = vmov (!%p106_p9), 920167782   ;;  %s119_s27 = sand.u32 (!%p106_p9), 1, %s541_s10  }
  0x10   : > { %v125_v2 = vmul.f32 (!%p106_p9), 6.2831855, %v124_v1  ;;  %v557_v30 = vmov (!%p106_p9), 1326507024   ;;  %s415_s28 = sshll.u32 (!%p106_p9), %s119_s27, 4  ;;  %s431_s29 = sshll.u32 (!%p106_p9), %s595_s13, 8 }
  0x11   : > { %s121_s30 = scalar_lea.vmem (!%p106_p9), [#allocation2], %s415_s28  ;;  %s657_s6 = scalar_lea.hbm (!%p106_p9), %s703_s2, %s431_s29 }
  0x12   : > { %129 = vperm.xlu0 (!%p106_p9), %482, %v125_v2   ;;  %s363_s3 = sshll.u32 (!%p106_p9), %s121_s30, 4  ;;  %s349_s7 = scalar_lea.sflag (!%p106_p9), [#allocation3], %s119_s27  ;;  %s659_s3 = int_to_ptr.vmem [resolvable:$true] %s363_s3 }
  0x13   : > { %s487_s8 = scalar_lea.vmem (!%p106_p9), %s659_s3, 256  ;;  %s558_s13 = smov (!%p106_p9), [#allocation2]  }
  0x14   : > { %p488_p10 = scmp.ne.s32.totalorder (!%p106_p9), %s659_s3, %s487_s8  ;;  %s491_s14 = sshll.u32 (!%p106_p9), %s558_s13, 4  ;;  %s492_s14 = int_to_ptr.vmem [resolvable:$false] %s491_s14 }
  0x15   : > { %s493_s16 = scalar_lea.vmem %s492_s14, 512  ;;  %p494_p13 = scmp.lt.s32.totalorder %s659_s3, %s492_s14 }
  0x16   : > { %p489_p11 = pnand %p488_p10, %p612_p5  ;;  %p495_p0 = scmp.lt.s32.totalorder %s493_s16, %s487_s8 }
  0x18   : > { %p490_p12 = pneg %p489_p11  ;;  %p496_p1 = por %p495_p0, %p494_p13 }
  0x1a   : > { %p497_p2 = pnand %p496_p1, %p490_p12 }
  0x91   : > { %v130_v4 = vpop.permute.xlu0 %129 }
  0x92   : > { %v629_v5 = vmul.f32 %v417_v3, %v130_v4 }
  0x94   : > { %v142_v6 = vand.u32 2139095040, %v629_v5  ;;  %v139_v10 = vand.u32 2147483647, %v629_v5  ;;  %vm141_vm7 = vcmp.lt.s32.totalorder %v629_v5, 0  ;;  %vm231_vm15 = vweird.f32 %v629_v5 }
  0x96   : > { %v143_v7 = vshrl.u32 %v142_v6, 23  ;;  %v146_v13 = vand.u32 8388607, %v139_v10  ;;  %vm140_vm8 = vcmp.le.f32.partialorder %v139_v10, 0.7853982 }
  0x98   : > { %v418_v8 = vadd.s32 4294967169, %v143_v7  ;;  %v147_v32 = vor.u32 8388608, %v146_v13 }
  0x9a   : > { %v149_v9 = vadd.s32 1, %v418_v8  ;;  %v187_v46 = vshll.u32 %v147_v32, 8 }
  0x9c   : > { %vm150_vm0 = vcmp.gt.s32.totalorder %v149_v9, 0 }
  0x9d   : > { %v151_v11 = vsel %vm150_vm0, %v149_v9, 0 }
  0x9e   : > { %v153_v12 = vand.u32 31, %v151_v11  ;;  %v152_v15 = vshrl.u32 %v151_v11, 5 }
  0xa0   : > { %v154_v14 = vsub.s32 32, %v153_v12  ;;  %v156_v17 = vshll.u32 %v552_v16, %v153_v12  ;;  %v159_v19 = vshll.u32 %v553_v18, %v153_v12  ;;  %v162_v23 = vshll.u32 %v554_v21, %v153_v12 }
  0xa1   : > { %v165_v26 = vshll.u32 %v555_v24, %v153_v12  ;;  %v168_v29 = vshll.u32 %v556_v27, %v153_v12  ;;  %vm171_vm1 = vcmp.lt.s32.totalorder %v152_v15, 1  ;;  %vm174_vm2 = vcmp.lt.s32.totalorder %v152_v15, 4 }
  0xa2   : > { %v157_v20 = vshrl.u32 %v553_v18, %v154_v14  ;;  %v160_v22 = vshrl.u32 %v554_v21, %v154_v14  ;;  %v163_v25 = vshrl.u32 %v555_v24, %v154_v14  ;;  %v166_v28 = vshrl.u32 %v556_v27, %v154_v14 }
  0xa3   : > { %v169_v31 = vshrl.u32 %v557_v30, %v154_v14  ;;  %v155_v41 = vshrl.u32 %v552_v16, %v154_v14  ;;  %vm173_vm3 = vcmp.lt.s32.totalorder %v152_v15, 3  ;;  %vm172_vm4 = vcmp.lt.s32.totalorder %v152_v15, 2 }
  0xa4   : > { %v158_v33 = vor.u32 %v157_v20, %v156_v17  ;;  %v161_v34 = vor.u32 %v160_v22, %v159_v19  ;;  %v164_v35 = vor.u32 %v163_v25, %v162_v23  ;;  %v167_v36 = vor.u32 %v166_v28, %v165_v26 }
  0xa5   : > { %v170_v37 = vor.u32 %v169_v31, %v168_v29 }
  0xa6   : > { %v176_v38 = vsel %vm174_vm2, %v164_v35, 2102212464  ;;  %v179_v39 = vsel %vm171_vm1, %v158_v33, %v161_v34  ;;  %v183_v40 = vsel %vm171_vm1, %v161_v34, %v164_v35  ;;  %v180_v42 = vsel %vm174_vm2, %v167_v36, 920167782 }
  0xa7   : > { %v184_v43 = vsel %vm174_vm2, %v170_v37, 1326507024  ;;  %v181_v44 = vsel %vm173_vm3, %v164_v35, %v180_v42  ;;  %v175_v47 = vsel %vm171_vm1, %v155_v41, %v158_v33  ;;  %v177_v48 = vsel %vm173_vm3, %v161_v34, %v176_v38 }
  0xa8   : > { %v185_v45 = vsel %vm173_vm3, %v167_v36, %v184_v43  ;;  %v182_v49 = vsel %vm172_vm4, %v179_v39, %v181_v44  ;;  %v178_v55 = vsel %vm172_vm4, %v175_v47, %v177_v48 }
  0xa9   : > { %v186_v50 = vsel %vm172_vm4, %v183_v40, %v185_v45  ;;  %v638_v53 = vmul.u32.u64.low %v187_v46, %v182_v49  ;;  %v639_v54 = vmul.u32.u64.high %v187_v46, %v182_v49, %v638_v53  ;;  %v194_v57 = vmul.u32 %v187_v46, %v178_v55 }
  0xaa   : > { %v635_v51 = vmul.u32.u64.low %v187_v46, %v186_v50  ;;  %v636_v52 = vmul.u32.u64.high %v187_v46, %v186_v50, %v635_v51 }
  0xab   : > { %v197_v56 = vadd.s32 1, %v639_v54 }
  0xac   : > { %vm196_vm5 = vc.u32 %v636_v52, %v638_v53  ;;  %v195_v6 = vadd.s32 %v638_v53, %v636_v52 }
  0xad   : > { %v198_v58 = vsel %vm196_vm5, %v197_v56, %v639_v54 }
  0xae   : > { %v199_v59 = vadd.s32 %v198_v58, %v194_v57 }
  0xb0   : > { %v200_v60 = vadd.s32 536870912, %v199_v59 }
  0xb2   : > { %v201_v61 = vshrl.u32 %v200_v60, 30 }
  0xb4   : > { %v202_v62 = vshll.u32 %v201_v61, 30  ;;  %v225_v19 = vsub.s32 4, %v201_v61 }
  0xb6   : > { %v203_v63 = vsub.s32 %v199_v59, %v202_v62  ;;  %v226_v22 = vsel %vm141_vm7, %v225_v19, %v201_v61 }
  0xb7   : > { %v228_v24 = vsel %vm140_vm8, 0, %v226_v22 }
  0xb8   : > { %v205_v0 = vsub.s32 0, %v203_v63  ;;  %v232_v25 = vadd.s32 3, %v228_v24  ;;  %v337_v27 = vand.u32 3, %v228_v24 }
  0xba   : > { %v419_v1 = vmin.u32 %v205_v0, %v203_v63  ;;  %v233_v26 = vand.u32 3, %v232_v25  ;;  %vm342_vm10 = vcmp.eq.s32.totalorder %v337_v27, 2  ;;  %vm339_vm12 = vcmp.eq.s32.totalorder %v337_v27, 0 }
  0xbb   : > { %vm338_vm14 = vcmp.lt.s32.totalorder %v337_v27, 2 }
  0xbc   : > { %v207_v2 = vclz %v419_v1  ;;  %vm238_vm9 = vcmp.eq.s32.totalorder %v233_v26, 2  ;;  %vm235_vm11 = vcmp.eq.s32.totalorder %v233_v26, 0  ;;  %vm234_vm13 = vcmp.lt.s32.totalorder %v233_v26, 2 }
  0xbe   : > { %v420_v3 = vadd.s32 4294967294, %v207_v2 }
  0xc0   : > { %vm421_vm6 = vcmp.lt.s32.totalorder %v420_v3, 0 }
  0xc1   : > { %v210_v4 = vsel %vm421_vm6, 0, %v420_v3 }
  0xc2   : > { %v211_v7 = vsub.s32 32, %v210_v4  ;;  %v215_v8 = vsub.s32 4294967266, %v210_v4  ;;  %v212_v9 = vshll.u32 %v203_v63, %v210_v4 }
  0xc4   : > { %v213_v11 = vshrl.u32 %v195_v6, %v211_v7  ;;  %v216_v12 = vadd.s32 127, %v215_v8 }
  0xc6   : > { %v214_v13 = vor.u32 %v213_v11, %v212_v9  ;;  %v217_v14 = vshll.u32 %v216_v12, 23 }
  0xc8   : > { %v218_v15 = vor.u32 4788187, %v217_v14  ;;  %v221_v17 = vcvt.s32.f32 %v214_v13 }
  0xca   : > { %v219_v16 = vand.u32 2147483647, %v218_v15 }
  0xcc   : > { %v222_v18 = vmul.f32 %v221_v17, %v219_v16 }
  0xce   : > { %v223_v20 = vxor.u32 2147483648, %v222_v18 }
  0xd0   : > { %v224_v21 = vsel %vm141_vm7, %v223_v20, %v222_v18 }
  0xd1   : > { %v227_v23 = vsel %vm140_vm8, %v629_v5, %v224_v21 }
  0xd2   : > { %483 = vcosq.f32 %v227_v23 }
  0xd3   : > { %485 = vsinq.f32 %v227_v23 }
  0xdc   : > { %v484_v28 = vpop.eup %483 }
  0xdd   : > { %v486_v29 = vpop.eup %485  ;;  %v239_v30 = vxor.u32 2147483648, %v484_v28 }
  0xde   : > { %v236_v31 = vxor.u32 2147483648, %v486_v29 }
  0xdf   : > { %v240_v10 = vsel %vm238_vm9, %v239_v30, %v486_v29  ;;  %v344_v32 = vsel %vm342_vm10, %v239_v30, %v486_v29 }
  0xe0   : > { %v237_v33 = vsel %vm235_vm11, %v484_v28, %v236_v31  ;;  %v341_v34 = vsel %vm339_vm12, %v484_v28, %v236_v31 }
  0xe1   : > { %v241_v35 = vsel %vm234_vm13, %v237_v33, %v240_v10  ;;  %v345_v36 = vsel %vm338_vm14, %v341_v34, %v344_v32 }
  0xe2   : > { %v242_v37 = vsel %vm231_vm15, nan, %v241_v35  ;;  %v346_v38 = vsel %vm231_vm15, nan, %v345_v36 }
  0xe3   : > { %243 = vst [vmem:[%s121_s30] sm:$0xff] %v242_v37  ;;  %347 = vst [vmem:[%s121_s30 + $0x8] sm:$0xff] %v346_v38 }
  0xe4   : > { %500 = shalt.err (!%p497_p2)
}
  0xe5   : > { %s501_s17 = scalar_lea.hbm %s657_s6, 256  ;;  %s505_s23 = scalar_lea.hbm %s703_s2, 512 }
  0xe6   : > { %p502_p3 = scmp.ne.s32.totalorder %s657_s6, %s501_s17  ;;  %p506_p8 = scmp.lt.u32.totalorder %s657_s6, %s703_s2 }
  0xe7   : > { %p507_p9 = scmp.lt.u32.totalorder %s505_s23, %s501_s17  ;;  %p509_p11 = scmp.lt.u32.totalorder %s501_s17, %s657_s6 }
  0xe8   : > { %p503_p4 = pnand %p502_p3, %p612_p5 }
  0xe9   : > { %p508_p10 = por %p507_p9, %p506_p8 }
  0xea   : > { %p504_p7 = pneg %p503_p4 }
  0xeb   : > { %p510_p12 = por %p509_p11, %p508_p10 }
  0xed   : > { %p511_p13 = pnand %p510_p12, %p504_p7 }
  0xef   : > { %514 = shalt.err (!%p511_p13)
}
  0xf0   : > { %436 = dma.vmem_to_hbm [thread:$0]  (%p612_p5), %s659_s3, 256, %s657_s6, %s349_s7  }
  0xf1 PF: > { %p442_p0 = scmp.ge.s32.totalorder %s549_s12, 2  ;;  %s375_s26 = sand.u32 1, %s537_s9  }
  0xf2   : > { %s376_s27 = scalar_lea.sflag [#allocation3], %s375_s26 }
  0xf3   : > { %p439_p1 = pnand %p442_p0, %p616_p6 }
  0xf5   : > { %532 = dma.done.wait (!%p439_p1), %s376_s27, 256  }
  0xf6   : > { %534 = vsyncadd (!%p439_p1), %s376_s27, 4294967040  ;;  %p12_p2 = scmp.ge.s32.totalorder %s599_s15, 4   ;;  %s706_s9 = smov %s541_s10 }
  0xf7   : > { %s707_s10 = smov %s545_s11  ;;  %s708_s11 = smov %s610_s18 }
  0xf8   : > { %s709_s12 = smov %s599_s15  ;;  %14 = sbr.rel (!%p12_p2) target bundleno = 3 (0x3), region = 61 }
  0xff   :  { %381 = vsyncpa [#allocation3], 1 }
 0x100   :  { %383 = vsyncpa [#allocation3 + $0x1], 1 }

</bundles_post_ra>
